<compile_context>
chip_gen: v6e
topology: v6e:2x2x1
jax: 0.10.0
libtpu: 0.0.40
codegen_flags: <defaults>
</compile_context>

<pallas_src>
import functools
import math

import jax
import jax.numpy as jnp
from jax.experimental import pallas as pl
from jax.experimental.pallas import tpu as pltpu

LOG_2PI = math.log(2.0 * math.pi)
LANES = 128
SUBLANES = 8
ROW_ALIGN = SUBLANES * LANES          # 1024: keeps rows a multiple of 8
NCORES = 2                            # leading "parallel" axis (v7x megacore)


def _gmm_kernel(nvalid_ref, loc_ref, a_ref, c_ref,    # scalar prefetch (SMEM)
                xs_ref,                                 # (TR, 128) VMEM data tile
                out_ref,                                # (1, 1, 1) per-core output
                acc_ref,                                # (8, 128) VMEM accumulator
                *, n_components, blocks_per_core):
    core = pl.program_id(0)
    i = pl.program_id(1)
    tr, lanes = xs_ref.shape                            # static
    block_elems = tr * lanes                            # static
    b = core * blocks_per_core + i                      # global block index (scalar)

    @pl.when(i == 0)
    def _():
        acc_ref[...] = jnp.zeros_like(acc_ref)

    x = xs_ref[...]                                     # (TR, 128) f32, lane-dense

    # Per-component log-prob, K unrolled (K tiny & static):
    #   lp_k = (x - loc_k)^2 * a_k + c_k
    # with a_k = -0.5/scale_k^2, c_k = log_phi_k - log(scale_k) - 0.5*log(2*pi)
    lps = []
    for k in range(n_components):
        d = x - loc_ref[k]
        lps.append(d * d * a_ref[k] + c_ref[k])

    # Exact logsumexp over components (full-width VPU/EUP ops, no XLU reduce).
    m = lps[0]
    for lp in lps[1:]:
        m = jnp.maximum(m, lp)
    s = jnp.exp(lps[0] - m)
    for lp in lps[1:]:
        s = s + jnp.exp(lp - m)
    lse = m + jnp.log(s)                                # (TR, 128)

    def fold(v):
        # Fold TR rows into 8 sublanes: (TR,128)->(TR//8,8,128) is a
        # vreg-aligned reshape; sum over the leading dim is plain vreg adds.
        if tr == SUBLANES:
            return v
        return jnp.sum(v.reshape(-1, SUBLANES, lanes), axis=0)

    # Only blocks that extend past n_valid (the true last data block and any
    # clamped dummy tail blocks) need masking; gate it on the scalar unit so
    # the hot path has no mask arithmetic.
    needs_mask = (b + 1) * block_elems > nvalid_ref[0]

    @pl.when(jnp.logical_not(needs_mask))
    def _():
        acc_ref[...] = acc_ref[...] + fold(lse)

    @pl.when(needs_mask)
    def _():
        thr = nvalid_ref[0] - b * block_elems           # scalar-unit arithmetic
        row_ids = jax.lax.broadcasted_iota(jnp.int32, (tr, lanes), 0)
        lane_ids = jax.lax.broadcasted_iota(jnp.int32, (tr, lanes), 1)
        local_idx = row_ids * lanes + lane_ids
        acc_ref[...] = acc_ref[...] + fold(jnp.where(local_idx < thr, lse, 0.0))

    @pl.when(i == pl.num_programs(1) - 1)
    def _():
        out_ref[...] = jnp.sum(acc_ref[...]).reshape(1, 1, 1)


def gmm_log_likelihood(xs, loc, scale, log_phi, *, max_tile_rows=2048):
    """sum_n logsumexp_k [ Normal(loc_k, scale_k).log_prob(x_n) + log_phi_k ]."""
    n = int(xs.shape[0])
    k = int(loc.shape[0])
    assert n > 0
    assert max_tile_rows >= SUBLANES and max_tile_rows % SUBLANES == 0

    # Lane-dense layout (rows, 128); avoid a full padded copy when possible.
    if n % ROW_ALIGN == 0:
        xs2 = xs.astype(jnp.float32).reshape(-1, LANES)          # free reshape
    else:
        n_pad = -(-n // ROW_ALIGN) * ROW_ALIGN                   # next mult of 1024
        xs2 = (jnp.zeros((n_pad,), jnp.float32)
               .at[:n].set(xs.astype(jnp.float32))
               .reshape(-1, LANES))
    rows = xs2.shape[0]                                          # multiple of 8

    tile_rows = min(max_tile_rows, rows)                         # multiple of 8
    n_blocks = -(-rows // tile_rows)
    blocks_per_core = -(-n_blocks // NCORES)
    block_elems = tile_rows * LANES
    # int32 index math inside the kernel
    assert (NCORES * blocks_per_core + 1) * block_elems < 2**31

    loc_s = loc.astype(jnp.float32)
    a_s = (-0.5 / (scale * scale)).astype(jnp.float32)
    c_s = (log_phi - jnp.log(scale) - 0.5 * LOG_2PI).astype(jnp.float32)
    nvalid = jnp.array([n], dtype=jnp.int32)

    kernel = functools.partial(_gmm_kernel, n_components=k,
                               blocks_per_core=blocks_per_core)

    def xs_map(core, i, *_):
        # Clamp dummy tail iterations onto the last real block; their
        # contribution is masked to exactly zero inside the kernel.
        return (jnp.minimum(core * blocks_per_core + i, n_blocks - 1), 0)

    out = pl.pallas_call(
        kernel,
        out_shape=jax.ShapeDtypeStruct((NCORES, 1, 1), jnp.float32),
        grid_spec=pltpu.PrefetchScalarGridSpec(
            num_scalar_prefetch=4,
            grid=(NCORES, blocks_per_core),
            in_specs=[pl.BlockSpec((tile_rows, LANES), xs_map)],
            out_specs=pl.BlockSpec((1, 1, 1), lambda core, i, *_: (core, 0, 0)),
            scratch_shapes=[pltpu.VMEM((SUBLANES, LANES), jnp.float32)],
        ),
        compiler_params=pltpu.CompilerParams(
            dimension_semantics=("parallel", "arbitrary"),   # cores x reduction
            vmem_limit_bytes=32 * 1024 * 1024,
        ),
    )(nvalid, loc_s, a_s, c_s, xs2)
    return jnp.sum(out)                                   # combine per-core partials


def build_params(n_components, loc_mean_prior=0.0, loc_scale_prior=1.0,
                 scale_prior=1.0):
    """Deterministic stand-ins for the Normal / HalfNormal / Simplex parameter
    modules.  Returns constrained values + the constraint contribution,
    mirroring `loc(None)`, `scale(None)`, `phi(None)`."""
    k = n_components
    # Normal('mean'): unconstrained parameter -> identity transform, constraint 0.
    loc_raw = jnp.linspace(-2.0, 3.0, k, dtype=jnp.float32) * loc_scale_prior + loc_mean_prior
    loc = loc_raw
    loc_constraint = jnp.float32(0.0)

    # HalfNormal('scale'): positivity via exp; log|d exp/dx| = sum(x).
    scale_raw = jnp.linspace(-0.5, 0.5, k, dtype=jnp.float32) * scale_prior
    scale = jnp.exp(scale_raw)
    scale_constraint = jnp.sum(scale_raw)

    # Simplex('phi').log(): log mixture weights via log-softmax.
    # TODO(synk): exact stick-breaking log-det-Jacobian of the reference
    # Simplex class is unspecified; constraint contribution set to 0 here.
    phi_raw = jnp.linspace(0.1, 0.4, k, dtype=jnp.float32)
    log_phi = jax.nn.log_softmax(phi_raw)
    phi_constraint = jnp.float32(0.0)

    constraint_contrib = loc_constraint + scale_constraint + phi_constraint
    return loc, scale, log_phi, constraint_contrib


def model_forward(xs, loc, scale, log_phi, constraint_contrib):
    # Hot path (log_prob + logsumexp + sum) runs in the Pallas kernel;
    # adding the scalar constraint is glue.
    return constraint_contrib + gmm_log_likelihood(xs, loc, scale, log_phi)


def reference_forward(xs, loc, scale, log_phi, constraint_contrib):
    lp = (-0.5 * ((xs[:, None] - loc[None, :]) / scale[None, :]) ** 2
          - jnp.log(scale[None, :]) - 0.5 * LOG_2PI)
    lp = lp + log_phi[None, :]
    lp = jax.scipy.special.logsumexp(lp, axis=1)
    return constraint_contrib + jnp.sum(lp)


if __name__ == "__main__":
    n_components = 4

    key = jax.random.PRNGKey(0)
    k0, k1 = jax.random.split(key)

    loc, scale, log_phi, constraint_contrib = build_params(
        n_components, loc_mean_prior=0.0, loc_scale_prior=1.0, scale_prior=1.0)

    # Case A: small input, single block per core.
    xs_a = jax.random.normal(k0, (256,), dtype=jnp.float32) * 1.5 + 0.3
    out_a = jax.block_until_ready(
        model_forward(xs_a, loc, scale, log_phi, constraint_contrib))
    ref_a = reference_forward(xs_a, loc, scale, log_phi, constraint_contrib)
    assert jnp.allclose(out_a, ref_a, rtol=1e-5, atol=1e-4), (out_a, ref_a)

    # Case B: ragged length, multiple blocks per core, masked boundary block
    # and a clamped dummy tail block (small tile forced for coverage).
    xs_b = jax.random.normal(k1, (2304,), dtype=jnp.float32) * 2.0 - 0.7
    out_b = jax.block_until_ready(
        constraint_contrib + gmm_log_likelihood(xs_b, loc, scale, log_phi,
                                                max_tile_rows=8))
    ref_b = reference_forward(xs_b, loc, scale, log_phi, constraint_contrib)
    assert jnp.allclose(out_b, ref_b, rtol=1e-4, atol=1e-3), (out_b, ref_b)

    # Case C: same data with the default (large) tile -> exercises the
    # (8,128) sublane fold of a multi-row tile.
    out_c = jax.block_until_ready(
        constraint_contrib + gmm_log_likelihood(xs_b, loc, scale, log_phi))
    assert jnp.allclose(out_c, ref_b, rtol=1e-4, atol=1e-3), (out_c, ref_b)

    print("KERNEL_OK")
</pallas_src>

<mosaic_0001>
module attributes {stable_mosaic.version = 11 : i64} {
  func.func @_gmm_kernel(%arg0: i32, %arg1: i32, %arg2: memref<1xi32, #tpu.memory_space<smem>>, %arg3: memref<4xf32, #tpu.memory_space<smem>>, %arg4: memref<4xf32, #tpu.memory_space<smem>>, %arg5: memref<4xf32, #tpu.memory_space<smem>>, %arg6: memref<8x128xf32, #tpu.memory_space<vmem>>, %arg7: memref<1x1x1xf32, #tpu.memory_space<vmem>>, %arg8: memref<8x128xf32, #tpu.memory_space<vmem>>) attributes {dimension_semantics = [#tpu.dimension_semantics<parallel>, #tpu.dimension_semantics<arbitrary>], iteration_bounds = array<i64: 2, 1>, scalar_prefetch = 4 : i64, scratch_operands = 1 : i64, tpu.core_type = #tpu.core_type<tc>, window_params = [{transform_indices = @transform_0, window_bounds = array<i64: 8, 128>}, {transform_indices = @transform_1, window_bounds = array<i64: 1, 1, 1>}]} {
    %c1_i32 = arith.constant 1 : i32
    %0 = arith.muli %arg0, %c1_i32 : i32
    %1 = arith.addi %0, %arg1 : i32
    %c0_i32 = arith.constant 0 : i32
    %2 = arith.cmpi eq, %arg1, %c0_i32 : i32
    %3 = arith.extui %2 : i1 to i32
    %c0_i32_0 = arith.constant 0 : i32
    %4 = arith.cmpi ne, %3, %c0_i32_0 : i32
    scf.if %4 {
      %cst = arith.constant 0.000000e+00 : f32
      %74 = vector.broadcast %cst : f32 to vector<8x128xf32>
      %c0_17 = arith.constant 0 : index
      %c0_18 = arith.constant 0 : index
      %75 = vector.load %arg8[%c0_17, %c0_18] : memref<8x128xf32, #tpu.memory_space<vmem>>, vector<8x128xf32>
      tpu.vector_store %arg8[%c0_17, %c0_18], %74 {strides = array<i32>} : memref<8x128xf32, #tpu.memory_space<vmem>>, vector<8x128xf32>,
    } else {
    }
    %c0 = arith.constant 0 : index
    %c0_1 = arith.constant 0 : index
    %5 = vector.load %arg6[%c0, %c0_1] : memref<8x128xf32, #tpu.memory_space<vmem>>, vector<8x128xf32>
    %c0_2 = arith.constant 0 : index
    %6 = memref.load %arg3[%c0_2] : memref<4xf32, #tpu.memory_space<smem>>
    %7 = vector.broadcast %6 : f32 to vector<8x128xf32>
    %8 = arith.subf %5, %7 : vector<8x128xf32>
    %9 = arith.mulf %8, %8 : vector<8x128xf32>
    %c0_3 = arith.constant 0 : index
    %10 = memref.load %arg4[%c0_3] : memref<4xf32, #tpu.memory_space<smem>>
    %11 = vector.broadcast %10 : f32 to vector<8x128xf32>
    %12 = arith.mulf %9, %11 : vector<8x128xf32>
    %c0_4 = arith.constant 0 : index
    %13 = memref.load %arg5[%c0_4] : memref<4xf32, #tpu.memory_space<smem>>
    %14 = vector.broadcast %13 : f32 to vector<8x128xf32>
    %15 = arith.addf %12, %14 : vector<8x128xf32>
    %c1 = arith.constant 1 : index
    %16 = memref.load %arg3[%c1] : memref<4xf32, #tpu.memory_space<smem>>
    %17 = vector.broadcast %16 : f32 to vector<8x128xf32>
    %18 = arith.subf %5, %17 : vector<8x128xf32>
    %19 = arith.mulf %18, %18 : vector<8x128xf32>
    %c1_5 = arith.constant 1 : index
    %20 = memref.load %arg4[%c1_5] : memref<4xf32, #tpu.memory_space<smem>>
    %21 = vector.broadcast %20 : f32 to vector<8x128xf32>
    %22 = arith.mulf %19, %21 : vector<8x128xf32>
    %c1_6 = arith.constant 1 : index
    %23 = memref.load %arg5[%c1_6] : memref<4xf32, #tpu.memory_space<smem>>
    %24 = vector.broadcast %23 : f32 to vector<8x128xf32>
    %25 = arith.addf %22, %24 : vector<8x128xf32>
    %c2 = arith.constant 2 : index
    %26 = memref.load %arg3[%c2] : memref<4xf32, #tpu.memory_space<smem>>
    %27 = vector.broadcast %26 : f32 to vector<8x128xf32>
    %28 = arith.subf %5, %27 : vector<8x128xf32>
    %29 = arith.mulf %28, %28 : vector<8x128xf32>
    %c2_7 = arith.constant 2 : index
    %30 = memref.load %arg4[%c2_7] : memref<4xf32, #tpu.memory_space<smem>>
    %31 = vector.broadcast %30 : f32 to vector<8x128xf32>
    %32 = arith.mulf %29, %31 : vector<8x128xf32>
    %c2_8 = arith.constant 2 : index
    %33 = memref.load %arg5[%c2_8] : memref<4xf32, #tpu.memory_space<smem>>
    %34 = vector.broadcast %33 : f32 to vector<8x128xf32>
    %35 = arith.addf %32, %34 : vector<8x128xf32>
    %c3 = arith.constant 3 : index
    %36 = memref.load %arg3[%c3] : memref<4xf32, #tpu.memory_space<smem>>
    %37 = vector.broadcast %36 : f32 to vector<8x128xf32>
    %38 = arith.subf %5, %37 : vector<8x128xf32>
    %39 = arith.mulf %38, %38 : vector<8x128xf32>
    %c3_9 = arith.constant 3 : index
    %40 = memref.load %arg4[%c3_9] : memref<4xf32, #tpu.memory_space<smem>>
    %41 = vector.broadcast %40 : f32 to vector<8x128xf32>
    %42 = arith.mulf %39, %41 : vector<8x128xf32>
    %c3_10 = arith.constant 3 : index
    %43 = memref.load %arg5[%c3_10] : memref<4xf32, #tpu.memory_space<smem>>
    %44 = vector.broadcast %43 : f32 to vector<8x128xf32>
    %45 = arith.addf %42, %44 : vector<8x128xf32>
    %46 = arith.maximumf %15, %25 : vector<8x128xf32>
    %47 = arith.maximumf %46, %35 : vector<8x128xf32>
    %48 = arith.maximumf %47, %45 : vector<8x128xf32>
    %49 = arith.subf %15, %48 : vector<8x128xf32>
    %50 = math.exp %49 : vector<8x128xf32>
    %51 = arith.subf %25, %48 : vector<8x128xf32>
    %52 = math.exp %51 : vector<8x128xf32>
    %53 = arith.addf %50, %52 : vector<8x128xf32>
    %54 = arith.subf %35, %48 : vector<8x128xf32>
    %55 = math.exp %54 : vector<8x128xf32>
    %56 = arith.addf %53, %55 : vector<8x128xf32>
    %57 = arith.subf %45, %48 : vector<8x128xf32>
    %58 = math.exp %57 : vector<8x128xf32>
    %59 = arith.addf %56, %58 : vector<8x128xf32>
    %60 = math.log %59 : vector<8x128xf32>
    %61 = arith.addf %48, %60 : vector<8x128xf32>
    %c1_i32_11 = arith.constant 1 : i32
    %62 = arith.addi %1, %c1_i32_11 : i32
    %c1024_i32 = arith.constant 1024 : i32
    %63 = arith.muli %62, %c1024_i32 : i32
    %c0_12 = arith.constant 0 : index
    %64 = memref.load %arg2[%c0_12] : memref<1xi32, #tpu.memory_space<smem>>
    %65 = arith.cmpi sgt, %63, %64 : i32
    %true = arith.constant true
    %66 = arith.xori %65, %true : i1
    %67 = arith.extui %66 : i1 to i32
    %c0_i32_13 = arith.constant 0 : i32
    %68 = arith.cmpi ne, %67, %c0_i32_13 : i32
    scf.if %68 {
      %c0_17 = arith.constant 0 : index
      %c0_18 = arith.constant 0 : index
      %74 = vector.load %arg8[%c0_17, %c0_18] : memref<8x128xf32, #tpu.memory_space<vmem>>, vector<8x128xf32>
      %75 = arith.addf %74, %61 : vector<8x128xf32>
      %c0_19 = arith.constant 0 : index
      %c0_20 = arith.constant 0 : index
      %76 = vector.load %arg8[%c0_19, %c0_20] : memref<8x128xf32, #tpu.memory_space<vmem>>, vector<8x128xf32>
      tpu.vector_store %arg8[%c0_19, %c0_20], %75 {strides = array<i32>} : memref<8x128xf32, #tpu.memory_space<vmem>>, vector<8x128xf32>,
    } else {
    }
    %69 = arith.extui %65 : i1 to i32
    %c0_i32_14 = arith.constant 0 : i32
    %70 = arith.cmpi ne, %69, %c0_i32_14 : i32
    scf.if %70 {
      %c0_17 = arith.constant 0 : index
      %74 = memref.load %arg2[%c0_17] : memref<1xi32, #tpu.memory_space<smem>>
      %c1024_i32_18 = arith.constant 1024 : i32
      %75 = arith.muli %1, %c1024_i32_18 : i32
      %76 = arith.subi %74, %75 : i32
      %77 = tpu.iota {dimensions = array<i32: 0>} : vector<8x128xi32>
      %78 = tpu.iota {dimensions = array<i32: 1>} : vector<8x128xi32>
      %c128_i32 = arith.constant 128 : i32
      %79 = vector.broadcast %c128_i32 : i32 to vector<8x128xi32>
      %80 = arith.muli %77, %79 : vector<8x128xi32>
      %81 = arith.addi %80, %78 : vector<8x128xi32>
      %c0_19 = arith.constant 0 : index
      %c0_20 = arith.constant 0 : index
      %82 = vector.load %arg8[%c0_19, %c0_20] : memref<8x128xf32, #tpu.memory_space<vmem>>, vector<8x128xf32>
      %83 = vector.broadcast %76 : i32 to vector<8x128xi32>
      %84 = arith.cmpi slt, %81, %83 : vector<8x128xi32>
      %cst = arith.constant 0.000000e+00 : f32
      %85 = vector.broadcast %cst : f32 to vector<8x128xf32>
      %86 = arith.select %84, %61, %85 : vector<8x128xi1>, vector<8x128xf32>
      %87 = arith.addf %82, %86 : vector<8x128xf32>
      %c0_21 = arith.constant 0 : index
      %c0_22 = arith.constant 0 : index
      %88 = vector.load %arg8[%c0_21, %c0_22] : memref<8x128xf32, #tpu.memory_space<vmem>>, vector<8x128xf32>
      tpu.vector_store %arg8[%c0_21, %c0_22], %87 {strides = array<i32>} : memref<8x128xf32, #tpu.memory_space<vmem>>, vector<8x128xf32>,
    } else {
    }
    %c0_i32_15 = arith.constant 0 : i32
    %71 = arith.cmpi eq, %arg1, %c0_i32_15 : i32
    %72 = arith.extui %71 : i1 to i32
    %c0_i32_16 = arith.constant 0 : i32
    %73 = arith.cmpi ne, %72, %c0_i32_16 : i32
    scf.if %73 {
      %c0_17 = arith.constant 0 : index
      %c0_18 = arith.constant 0 : index
      %74 = vector.load %arg8[%c0_17, %c0_18] : memref<8x128xf32, #tpu.memory_space<vmem>>, vector<8x128xf32>
      %75 = vector.shape_cast %74 : vector<8x128xf32> to vector<1x8x128xf32>
      %cst = arith.constant dense<0.000000e+00> : vector<1xf32>
      %76 = vector.multi_reduction <add>, %75, %cst [1, 2] : vector<1x8x128xf32> to vector<1xf32>
      %77 = vector.shape_cast %76 : vector<1xf32> to vector<1x1x1xf32>
      %78 = vector.extract %77[0, 0, 0] : f32 from vector<1x1x1xf32>
      %79 = vector.broadcast %78 : f32 to vector<1x1x1xf32>
      %c0_19 = arith.constant 0 : index
      %c0_20 = arith.constant 0 : index
      %c0_21 = arith.constant 0 : index
      %80 = vector.load %arg7[%c0_19, %c0_20, %c0_21] : memref<1x1x1xf32, #tpu.memory_space<vmem>>, vector<1x1x1xf32>
      tpu.vector_store %arg7[%c0_19, %c0_20, %c0_21], %79 {strides = array<i32>} : memref<1x1x1xf32, #tpu.memory_space<vmem>>, vector<1x1x1xf32>,
    } else {
    }
    return
  }
  func.func @transform_0(%arg0: i32, %arg1: i32, %arg2: memref<1xi32, #tpu.memory_space<smem>>, %arg3: memref<4xf32, #tpu.memory_space<smem>>, %arg4: memref<4xf32, #tpu.memory_space<smem>>, %arg5: memref<4xf32, #tpu.memory_space<smem>>) -> (i32, i32) {
    %c1_i32 = arith.constant 1 : i32
    %0 = arith.muli %arg0, %c1_i32 : i32
    %1 = arith.addi %0, %arg1 : i32
    %c0_i32 = arith.constant 0 : i32
    %2 = arith.minsi %1, %c0_i32 : i32
    %c0_i32_0 = arith.constant 0 : i32
    %c0_i32_1 = arith.constant 0 : i32
    return %2, %c0_i32_0 : i32, i32
  }
  func.func @transform_1(%arg0: i32, %arg1: i32, %arg2: memref<1xi32, #tpu.memory_space<smem>>, %arg3: memref<4xf32, #tpu.memory_space<smem>>, %arg4: memref<4xf32, #tpu.memory_space<smem>>, %arg5: memref<4xf32, #tpu.memory_space<smem>>) -> (i32, i32, i32) {
    %c0_i32 = arith.constant 0 : i32
    %c0_i32_0 = arith.constant 0 : i32
    %c0_i32_1 = arith.constant 0 : i32
    return %arg0, %c0_i32, %c0_i32_0 : i32, i32, i32
  }
}

</mosaic_0001>

<bundles_post_ra>
// kernel: tpu_custom_call.1
= control target key start
LH: loop header
LB: loop body
LE: loop exit
PB: predicated region body
PF: predicated region fallthrough
CT: control target
= control target key end

     0   :  { %s717_s0 = inlined_call_operand.<no memory space> [shape: s32[1], index: 0, kind: input, shape index: {}]   ;;  %s718_s1 = inlined_call_operand.vmem [shape: f32[4], index: 1, kind: input, shape index: {}]   ;;  %s719_s4 = inlined_call_operand.hbm [shape: f32[8,128], index: 4, kind: input, shape index: {}]   ;;  %s720_s5 = inlined_call_operand.vmem [shape: f32[2,1,1], index: 5, kind: output, shape index: {}]   ;;  %s721_s2 = inlined_call_operand.vmem [shape: f32[4], index: 2, kind: input, shape index: {}]   ;;  %s722_s3 = inlined_call_operand.vmem [shape: f32[4], index: 3, kind: input, shape index: {}]  }
   0x1   :  { %10 = sst [smem:[#allocation4]] %s717_s0  ;;  %s11_s22 = sshll.u32 %s718_s1, 4  ;;  %s12_s22 = int_to_ptr.vmem [resolvable:$true] %s11_s22 }
   0x2   :  { %s15_s25 = sshll.u32 %s721_s2, 4  ;;  %s449_s26 = scalar_lea.vmem %s12_s22, 16  ;;  %s16_s25 = int_to_ptr.vmem [resolvable:$true] %s15_s25 }
   0x3   :  { %p450_p0 = scmp.ne.s32.totalorder %s12_s22, %s449_s26  ;;  %p454_p1 = scmp.lt.s32.totalorder %s12_s22, %s12_s22 }
   0x4   :  { %p455_p2 = scmp.lt.s32.totalorder %s449_s26, %s449_s26 }
   0x6   :  { %p456_p3 = por %p455_p2, %p454_p1 }
   0x8   :  { %p457_p4 = pnand %p456_p3, %p450_p0 }
   0xa   :  { %460 = shalt.err (!%p457_p4)  }
   0xb   :  { %s564_s27 = smov [#allocation5]   ;;  %s19_s29 = sshll.u32 %s722_s3, 4  ;;  %s20_s29 = int_to_ptr.vmem [resolvable:$true] %s19_s29 }
   0xc   :  { %14 = dma.vmem_to_smem %s12_s22, 16, %s564_s27, [#allocation3] }
   0xd   :  { %s461_s1 = scalar_lea.vmem %s16_s25, 16  ;;  %p466_p6 = scmp.lt.s32.totalorder %s16_s25, %s16_s25 }
   0xe   :  { %p462_p5 = scmp.ne.s32.totalorder %s16_s25, %s461_s1  ;;  %p467_p7 = scmp.lt.s32.totalorder %s461_s1, %s461_s1 }
  0x10   :  { %p468_p8 = por %p467_p7, %p466_p6 }
  0x12   :  { %p469_p9 = pnand %p468_p8, %p462_p5 }
  0x14   :  { %472 = shalt.err (!%p469_p9)  }
  0x15   :  { %s565_s2 = smov [#allocation6]   ;;  %s473_s30 = scalar_lea.vmem %s20_s29, 16 }
  0x16   :  { %18 = dma.vmem_to_smem %s16_s25, 16, %s565_s2, [#allocation3] }
  0x17   :  { %p474_p10 = scmp.ne.s32.totalorder %s20_s29, %s473_s30  ;;  %p478_p11 = scmp.lt.s32.totalorder %s20_s29, %s20_s29 }
  0x18   :  { %p479_p12 = scmp.lt.s32.totalorder %s473_s30, %s473_s30 }
  0x1a   :  { %p480_p13 = por %p479_p12, %p478_p11 }
  0x1c   :  { %p481_p0 = pnand %p480_p13, %p474_p10 }
  0x1e   :  { %484 = shalt.err (!%p481_p0)  }
  0x1f   :  { %s566_s6 = smov [#allocation7]  }
  0x20   :  { %22 = dma.vmem_to_smem %s20_s29, 16, %s566_s6, [#allocation3] }
  0x21   :  { %537 = dma.done.wait [#allocation3], 48 }
  0x22   :  { %538 = vsyncadd [#allocation3], 4294967248 }
  0x23   :  { %24 = sfence }
  0x24   :  { %25 = vsyncpa [#allocation9], 0 }
  0x25   :  { %27 = vsyncpa [#allocation9 + $0x1], 0  ;;  %s611_s3 = smov 0   ;;  %s613_s7 = smov 0  }
  0x26   :  { %s615_s8 = smov 0   ;;  %s617_s9 = smov 0  }
  0x27   :  { %s619_s10 = smov 0  }
  0x28 LB: > { %s353_s11 = sadd.s32 4294967295, %s562_s10   ;;  %s45_s12 = sadd.s32 1, %s558_s9  ;;  %s562_s10 = sphi %s619_s10, %s33_s10   ;;  %s558_s9 = sphi %s617_s9, %s731_s9   ;;  %s554_s8 = sphi %s615_s8, %s730_s8   ;;  %s550_s7 = sphi %s613_s7, %s707_s7   ;;  %s546_s3 = sphi %s611_s3, %s729_s3  }
  0x29   : > { %p47_p1 = scmp.ge.s32.totalorder %s45_s12, 2  ;;  %p543_p2 = scmp.ne.s32.totalorder %s550_s7, 0 }
  0x2a   : > { %p66_p3 = scmp.eq.s32.totalorder %s562_s10, 0  ;;  %p71_p4 = scmp.ne.s32.totalorder %s550_s7, %s546_s3 }
  0x2b   : > { %s733_s12 = smov (%p47_p1, %s45_s12), 0  ;;  %p72_p5 = scmp.eq.s32.totalorder %s353_s11, 0 }
  0x2c   : > { %p67_p6 = por %p543_p2, %p66_p3  ;;  %p386_p8 = scmp.lt.s32.totalorder %s562_s10, 2 }
  0x2d   : > { %p641_p7 = por %p72_p5, %p71_p4  ;;  %s567_s14 = smov [#allocation8]  }
  0x2e   : > { %s135_s15 = sshll.u32 %s567_s14, 4  ;;  %p646_p9 = pnand %p386_p8, %p67_p6  ;;  %s136_s15 = int_to_ptr.vmem [resolvable:$true] %s135_s15 }
  0x2f   : > { %s724_s13 = scalar_select %p641_p7, 1, 0 }
  0x30   : > { %s485_s19 = scalar_lea.hbm %s719_s4, 128  ;;  %p487_p13 = pneg %p646_p9 }
  0x31   : > { %p486_p12 = scmp.ne.s32.totalorder %s719_s4, %s485_s19  ;;  %p492_p2 = scmp.lt.s32.totalorder %s485_s19, %s485_s19 }
  0x33   : > { %p488_p0 = pnand %p487_p13, %p486_p12 }
  0x35   : > { %p489_p1 = pneg %p488_p0 }
  0x37   : > { %p494_p3 = pnand %p492_p2, %p489_p1 }
  0x39   : > { %497 = shalt.err (!%p494_p3)
}
  0x3a   : > { %s498_s22 = scalar_lea.vmem %s136_s15, 128  ;;  %s505_s23 = scalar_lea.vmem %s136_s15, 256 }
  0x3b   : > { %p499_p4 = scmp.ne.s32.totalorder %s136_s15, %s498_s22  ;;  %p506_p8 = scmp.lt.s32.totalorder %s136_s15, %s136_s15 }
  0x3c   : > { %p507_p10 = scmp.lt.s32.totalorder %s505_s23, %s498_s22 }
  0x3d   : > { %p501_p5 = pnand %p499_p4, %p487_p13 }
  0x3e   : > { %p508_p11 = por %p507_p10, %p506_p8 }
  0x3f   : > { %p502_p6 = pneg %p501_p5 }
  0x41   : > { %p509_p7 = pnand %p508_p11, %p502_p6 }
  0x43   : > { %512 = shalt.err (!%p509_p7)
}
  0x44   : > { %385 = dma.hbm_to_vmem [thread:$0]  (!%p646_p9), %s719_s4, 128, %s136_s15, [#allocation9]  }
  0x45   : > { %p726_p12 = scmp.lt.s32.totalorder %s562_s10, 3  ;;  %p727_p0 = scmp.ge.s32.totalorder %s562_s10, 1 }
  0x47   : > { %p141_p1 = pnand %p727_p0, %p726_p12 }
  0x48   : > { %s146_s26 = sand.u32 (!%p141_p1), 1, %s550_s7   ;;  %p728_p10 = scmp.ne.s32.totalorder (!%p141_p1), %s724_s13, 0 }
  0x49   : > { %144 = sbr.rel (%p141_p1) target bundleno = 380 (0x17c), region = 24  ;;  %s360_s27 = sshll.u32 (!%p141_p1), %s146_s26, 3 }
  0x4a   : > { %s147_s0 = scalar_lea.sflag (!%p141_p1), [#allocation9], %s146_s26  ;;  %s150_s28 = scalar_lea.vmem (!%p141_p1), [#allocation8], %s360_s27 }
  0x4e   : > { %540 = dma.done.wait (%p728_p10), %s147_s0, 128  }
  0x4f   : > { %542 = vsyncadd (%p728_p10), %s147_s0, 4294967168  ;;  %s376_s29 = sshll.u32 %s554_s8, 10  ;;  %s180_s1 = sld [smem:[#allocation5]]  ;;  %v568_v0 = vmov 0.0   ;;  %v179_v1 = vld [vmem:[%s150_s28] sm:$0xff] }
  0x50   : > { %178 = vst [vmem:[#allocation2] sm:$0xff] %v568_v0  ;;  %s677_s2 = sadd.s32 1024, %s376_s29  ;;  %s184_s30 = sld [smem:[#allocation6]] }
  0x51   : > { %s187_s6 = sld [smem:[#allocation7]]  ;;  %p170_p7 = scmp.lt.s32.totalorder %s554_s8, 1 }
  0x52   : > { %s361_s3 = sld [smem:[#allocation5 + $0x1]] }
  0x53   : > { %s362_s11 = sld [smem:[#allocation6 + $0x1]] }
  0x54   : > { %s679_s14 = sld [smem:[#allocation7 + $0x1]] }
  0x55   : > { %v181_v2 = vstv %s180_s1  ;;  %s364_s13 = sld [smem:[#allocation5 + $0x2]] }
  0x56   : > { %v182_v3 = vsub.f32 %v179_v1, %v181_v2  ;;  %s365_s15 = sld [smem:[#allocation6 + $0x2]]  ;;  %v185_v4 = vstv %s184_s30 }
  0x57   : > { %s366_s16 = sld [smem:[#allocation7 + $0x2]]  ;;  %v188_v9 = vstv %s187_s6 }
  0x58   : > { %v183_v5 = vmul.f32 %v182_v3, %v182_v3  ;;  %v191_v6 = vstv %s361_s3  ;;  %s367_s17 = sld [smem:[#allocation5 + $0x3]] }
  0x59   : > { %v192_v7 = vsub.f32 %v179_v1, %v191_v6  ;;  %s368_s18 = sld [smem:[#allocation6 + $0x3]]  ;;  %v195_v10 = vstv %s362_s11 }
  0x5a   : > { %v186_v8 = vmul.f32 %v185_v4, %v183_v5  ;;  %s369_s19 = sld [smem:[#allocation7 + $0x3]]  ;;  %v198_v13 = vstv %s679_s14 }
  0x5b   : > { %v193_v11 = vmul.f32 %v192_v7, %v192_v7  ;;  %v201_v12 = vstv %s364_s13  ;;  %s682_s20 = sld [smem:[#allocation4]] }
  0x5c   : > { %v202_v14 = vsub.f32 %v179_v1, %v201_v12  ;;  %s686_s21 = scalar_select %p170_p7, %s554_s8, 1  ;;  %v189_v15 = vadd.f32 %v188_v9, %v186_v8  ;;  %v205_v17 = vstv %s365_s15 }
  0x5d   : > { %v196_v16 = vmul.f32 %v195_v10, %v193_v11  ;;  %v208_v21 = vstv %s366_s16 }
  0x5e   : > { %v203_v18 = vmul.f32 %v202_v14, %v202_v14  ;;  %v211_v19 = vstv %s367_s17  ;;  %s172_s24 = scalar_lea.vmem %s720_s5, %s686_s21 }
  0x5f   : > { %v199_v20 = vadd.f32 %v198_v13, %v196_v16  ;;  %v212_v22 = vsub.f32 %v179_v1, %v211_v19  ;;  %v215_v24 = vstv %s368_s18 }
  0x60   : > { %v206_v23 = vmul.f32 %v205_v17, %v203_v18  ;;  %v218_v28 = vstv %s369_s19 }
  0x61   : > { %v213_v25 = vmul.f32 %v212_v22, %v212_v22  ;;  %v220_v26 = vmax.f32 %v189_v15, %v199_v20  ;;  %p371_p9 = scmp.gt.s32.totalorder %s677_s2, %s682_s20 }
  0x62   : > { %v209_v27 = vadd.f32 %v208_v21, %v206_v23 }
  0x63   : > { %v216_v29 = vmul.f32 %v215_v24, %v213_v25 }
  0x64   : > { %v221_v30 = vmax.f32 %v220_v26, %v209_v27 }
  0x65   : > { %v219_v31 = vadd.f32 %v218_v28, %v216_v29 }
  0x67   : > { %v222_v32 = vmax.f32 %v221_v30, %v219_v31 }
  0x69   : > { %v223_v33 = vsub.f32 %v189_v15, %v222_v32  ;;  %v226_v34 = vsub.f32 %v199_v20, %v222_v32  ;;  %v230_v35 = vsub.f32 %v209_v27, %v222_v32  ;;  %v234_v36 = vsub.f32 %v219_v31, %v222_v32 }
  0x6b   : > { %v224_v37 = vmul.f32 1.442695, %v223_v33  ;;  %v227_v38 = vmul.f32 1.442695, %v226_v34  ;;  %v231_v39 = vmul.f32 1.442695, %v230_v35 }
  0x6c   : > { %v235_v40 = vmul.f32 1.442695, %v234_v36 }
  0x6d   : > { %439 = vpow2.f32 %v224_v37 }
  0x6e   : > { %441 = vpow2.f32 %v227_v38 }
  0x6f   : > { %443 = vpow2.f32 %v231_v39 }
  0x70   : > { %445 = vpow2.f32 %v235_v40 }
  0x7a   : > { %v440_v41 = vpop.eup %439 }
  0x7b   : > { %v442_v42 = vpop.eup %441 }
  0x7c   : > { %v444_v43 = vpop.eup %443  ;;  %v229_v44 = vadd.f32 %v442_v42, %v440_v41 }
  0x7d   : > { %v446_v45 = vpop.eup %445 }
  0x7e   : > { %v233_v46 = vadd.f32 %v444_v43, %v229_v44 }
  0x80   : > { %v237_v47 = vadd.f32 %v446_v45, %v233_v46 }
  0x82   : > { %447 = vlog2.f32 %v237_v47 }
  0x8e   : > { %248 = sbr.rel (%p371_p9) target bundleno = 151 (0x97), region = 36 }
  0x8f   : > { %v448_v48 = vpop.eup %447 }
  0x90   : > { %v239_v49 = vmul.f32 0.6931472, %v448_v48 }
  0x92   : > { %v240_v50 = vadd.f32 %v239_v49, %v222_v32 }
  0x93   : > { %v249_v51 = vld [vmem:[#allocation2] sm:$0xff] }
  0x94   : > { %v250_v52 = vadd.f32 %v249_v51, %v240_v50 }
  0x96   : > { %251 = vst [vmem:[#allocation2] sm:$0xff] %v250_v52 }
  0x97 PF: > { %p372_p11 = scmp.le.s32.totalorder %s677_s2, %s682_s20 }
  0x98   : > { %s255_s25 = sld [smem:[#allocation4]] (!%p372_p11) }
  0x99   : > { %254 = sbr.rel (%p372_p11) target bundleno = 171 (0xab), region = 40 }
  0x9e   : > { %v258_v53 = vlaneseq  ;;  %s257_s26 = ssub.s32 %s255_s25, %s376_s29  ;;  %v264_v58 = vld [vmem:[#allocation2] sm:$0xff] }
  0x9f   : > { %v265_v59 = vstv %s257_s26 }
  0xa0   : > { %v259_v54 = vshrl.u32 %v258_v53, 7  ;;  %v261_v55 = vand.u32 127, %v258_v53 }
  0xa2   : > { %v262_v56 = vmul.u32 128, %v259_v54 }
  0xa4   : > { %v263_v57 = vadd.s32 %v262_v56, %v261_v55 }
  0xa6   : > { %vm266_vm0 = vcmp.lt.s32.totalorder %v263_v57, %v265_v59 }
  0xa7   : > { %v267_v60 = vsel %vm266_vm0, %v240_v50, 0.0 }
  0xa8   : > { %v268_v61 = vadd.f32 %v267_v60, %v264_v58 }
  0xaa   : > { %269 = vst [vmem:[#allocation2] sm:$0xff] %v268_v61 }
  0xab PF: > { %vm284_vm1 = vcmask 0  }
  0xb1   : > { %v273_v62 = vld [vmem:[#allocation2] sm:$0xff] }
  0xb2   : > { %274 = vadd.xlane.f32.xlu0 %v273_v62 }
 0x13b   : > { %v275_v63 = vpop.xlane.xlu0 %274 }
 0x13c   : > { %v276_v0 = vrot.slane %v275_v63, 4 }
 0x13e   : > { %v277_v1 = vadd.f32 %v276_v0, %v275_v63 }
 0x140   : > { %v278_v2 = vrot.slane %v277_v1, 2 }
 0x142   : > { %v279_v3 = vadd.f32 %v278_v2, %v277_v1 }
 0x144   : > { %v280_v4 = vrot.slane %v279_v3, 1 }
 0x146   : > { %v281_v5 = vadd.f32 %v280_v4, %v279_v3 }
 0x148   : > { %378 = vpush %v281_v5 }
 0x179   : > { %s379_s8 = spop %378 }
 0x17a   : > { %v283_v6 = vstv %s379_s8 }
 0x17b   : > { %285 = vst.msk [vmem:[%s172_s24] sm:$0x1] %vm284_vm1, %v283_v6 }
 0x17c PF: > { %s33_s10 = sadd.s32 1, %s562_s10   ;;  %s729_s3 = smov %s550_s7 }
 0x17d   : > { %p30_p13 = scmp.ge.s32.totalorder %s33_s10, 4   ;;  %s707_s7 = smov 0  }
 0x17e   : > { %s730_s8 = smov %s558_s9  ;;  %s731_s9 = smov %s733_s12 }
 0x17f   :  { %32 = sbr.rel (!%p30_p13) target bundleno = 40 (0x28), region = 80 }
 0x184   :  { %303 = vsyncpa [#allocation9], 1 }
 0x185   :  { %305 = vsyncpa [#allocation9 + $0x1], 1 }

</bundles_post_ra>
